<compile_context>
chip_gen: v7x
topology: tpu7x:2x2x1
jax: 0.10.0
libtpu: 0.0.40
codegen_flags: <defaults>
</compile_context>

<pallas_src>
import jax
import jax.numpy as jnp
import numpy as np
from jax.experimental import pallas as pl
from jax.experimental.pallas import tpu as pltpu


def _round_up(x, m):
    return ((x + m - 1) // m) * m


def _atac_embed_kernel(chrom_ref, pos_ref, centers_ref, logvar_ref, emb_ref,
                       out_ref):
    # chrom_ref  : (TB, 1)   int32 -- chromosome id per row of this batch tile
    # pos_ref    : (TB, 1)   f32   -- normalized position per row
    # centers_ref: (C, 1, N) f32   -- resident (same block every grid step)
    # logvar_ref : (C, 1, N) f32   -- resident
    # emb_ref    : (C, N, D) f32   -- resident
    # out_ref    : (TB, D)   f32
    pos = pos_ref[...]                                    # (TB, 1)
    chrom = chrom_ref[...]                                # (TB, 1) int32

    # Hoisted out of the chromosome loop: 0.5 / var = 0.5 * exp(-log_var).
    inv_two_var = 0.5 * jnp.exp(-logvar_ref[...])         # (C, 1, N)

    num_chr = centers_ref.shape[0]
    acc = jnp.zeros(out_ref.shape, jnp.float32)           # (TB, D)

    # C masked matmuls: rows whose chromosome != c contribute zero for c.
    for c in range(num_chr):
        cen = centers_ref[c]                              # (1, N)
        diff = pos - cen                                  # (TB, N)
        w = jnp.exp(-(diff * diff) * inv_two_var[c])      # (TB, N)

        # Per-row normalization over N (EUP reciprocal + one Newton step).
        denom = jnp.sum(w, axis=-1, keepdims=True)        # (TB, 1)
        inv = pl.reciprocal(denom, approx=True)
        inv = inv * (2.0 - denom * inv)                   # refine to ~f32 acc.
        w = w * inv

        w = jnp.where(chrom == c, w, 0.0)                 # mask other chrom
        acc = acc + jnp.dot(w, emb_ref[c],
                            preferred_element_type=jnp.float32)

    out_ref[...] = acc


def atac_seq_embedding(chromosome, position, embeddings, centers,
                       log_variances, *, tile_b=128):
    """Pallas forward.

    chromosome:    (B,)      int    -- 0-based chromosome index per example
    position:      (B, 1)    float  -- normalized position in [0, 1]
    embeddings:    (C, N, D) float
    centers:       (C, 1, N) float
    log_variances: (C, 1, N) float
    returns:       (B, D)    float32
    """
    B = position.shape[0]
    C, N, D = embeddings.shape

    TB = _round_up(min(tile_b, _round_up(B, 8)), 8)
    Bp = _round_up(B, TB)

    chrom = jnp.zeros((Bp, 1), jnp.int32)
    chrom = chrom.at[:B, 0].set(chromosome.astype(jnp.int32).reshape(B))
    pos = jnp.zeros((Bp, 1), jnp.float32)
    pos = pos.at[:B, 0].set(position.astype(jnp.float32).reshape(B))

    # Resident-table VMEM budget (v7x: 64 MiB physical / 32 MiB scoped default).
    # Raise the scoped limit when the tables are big but still fit.
    table_bytes = (C * N * D + 2 * C * N) * 4
    vmem_limit = None
    if table_bytes > 8 * 1024 * 1024:
        vmem_limit = min(100 * 1024 * 1024,
                         2 * table_bytes + 8 * TB * (N + D) * 4)
    # TODO(synk): if the tables exceed the VMEM budget of the target generation,
    # fall back to per-chromosome streaming (scalar-prefetch index_map design).

    out = pl.pallas_call(
        _atac_embed_kernel,
        out_shape=jax.ShapeDtypeStruct((Bp, D), jnp.float32),
        grid=(Bp // TB,),
        in_specs=[
            pl.BlockSpec((TB, 1), lambda i: (i, 0)),       # chromosome tile
            pl.BlockSpec((TB, 1), lambda i: (i, 0)),       # position tile
            pl.BlockSpec((C, 1, N), lambda i: (0, 0, 0)),  # centers (resident)
            pl.BlockSpec((C, 1, N), lambda i: (0, 0, 0)),  # log_var (resident)
            pl.BlockSpec((C, N, D), lambda i: (0, 0, 0)),  # embeddings (resident)
        ],
        out_specs=pl.BlockSpec((TB, D), lambda i: (i, 0)),
        compiler_params=pltpu.CompilerParams(
            dimension_semantics=("parallel",),
            vmem_limit_bytes=vmem_limit),
    )(chrom, pos, centers.astype(jnp.float32),
      log_variances.astype(jnp.float32), embeddings.astype(jnp.float32))

    return out[:B]


def reference_forward(chromosome, position, embeddings, centers,
                      log_variances):
    """Pure-JAX reference (same math as the module's per-example loop)."""
    cs = centers[chromosome]                              # (B, 1, N)
    vs = jnp.exp(log_variances[chromosome])               # (B, 1, N)
    es = embeddings[chromosome]                           # (B, N, D)
    pos = position[:, :, None]                            # (B, 1, 1)
    w = jnp.exp(-(pos - cs) ** 2 / (2.0 * vs))            # (B, 1, N)
    w = w / jnp.sum(w, axis=(1, 2), keepdims=True)
    return jnp.einsum("bn,bnd->bd", w[:, 0, :], es)


if __name__ == "__main__":
    # Small, module-consistent shapes.
    num_chromosomes = 4
    embedding_dim = 32
    n_emb_per_chr = 64
    batch = 20                      # not a multiple of the tile -> tests padding

    key = jax.random.PRNGKey(0)
    k_emb, k_chr, k_pos = jax.random.split(key, 3)

    # Deterministic parameter init mirroring __init__:
    #   embeddings ~ randn(N, D) per chromosome
    #   centers    = linspace(0, 1, N) per chromosome
    #   log_var    = full(-2.0)
    embeddings = jax.random.normal(
        k_emb, (num_chromosomes, n_emb_per_chr, embedding_dim), jnp.float32)
    centers = jnp.broadcast_to(
        jnp.linspace(0.0, 1.0, n_emb_per_chr, dtype=jnp.float32)[None, None, :],
        (num_chromosomes, 1, n_emb_per_chr))
    log_variances = jnp.full(
        (num_chromosomes, 1, n_emb_per_chr), -2.0, dtype=jnp.float32)

    # Inputs (chromosome indices are the 0-based parameter-table keys).
    chromosome = jax.random.randint(
        k_chr, (batch,), 0, num_chromosomes, dtype=jnp.int32)
    position = jax.random.uniform(k_pos, (batch, 1), dtype=jnp.float32)

    # tile_b=8 exercises the multi-step batch-tiled grid at this toy size.
    out = atac_seq_embedding(chromosome, position, embeddings, centers,
                             log_variances, tile_b=8)
    out = jax.block_until_ready(out)

    ref = reference_forward(chromosome, position, embeddings, centers,
                            log_variances)
    np.testing.assert_allclose(np.asarray(out), np.asarray(ref),
                               rtol=1e-4, atol=1e-4)
    print("KERNEL_OK")
</pallas_src>

<mosaic_0001>
module attributes {stable_mosaic.version = 11 : i64} {
  func.func @_atac_embed_kernel(%arg0: i32, %arg1: memref<8x1xi32, #tpu.memory_space<vmem>>, %arg2: memref<8x1xf32, #tpu.memory_space<vmem>>, %arg3: memref<4x1x64xf32, #tpu.memory_space<vmem>>, %arg4: memref<4x1x64xf32, #tpu.memory_space<vmem>>, %arg5: memref<4x64x32xf32, #tpu.memory_space<vmem>>, %arg6: memref<8x32xf32, #tpu.memory_space<vmem>>) attributes {dimension_semantics = [#tpu.dimension_semantics<parallel>], iteration_bounds = array<i64: 3>, scalar_prefetch = 0 : i64, scratch_operands = 0 : i64, tpu.core_type = #tpu.core_type<tc>, window_params = [{transform_indices = @transform_0, window_bounds = array<i64: 8, 1>}, {transform_indices = @transform_1, window_bounds = array<i64: 8, 1>}, {pipeline_mode = #tpu.pipeline_mode<synchronous>, transform_indices = @transform_2, window_bounds = array<i64: 4, 1, 64>}, {pipeline_mode = #tpu.pipeline_mode<synchronous>, transform_indices = @transform_3, window_bounds = array<i64: 4, 1, 64>}, {pipeline_mode = #tpu.pipeline_mode<synchronous>, transform_indices = @transform_4, window_bounds = array<i64: 4, 64, 32>}, {transform_indices = @transform_5, window_bounds = array<i64: 8, 32>}]} {
    %c0 = arith.constant 0 : index
    %c0_0 = arith.constant 0 : index
    %0 = vector.load %arg2[%c0, %c0_0] : memref<8x1xf32, #tpu.memory_space<vmem>>, vector<8x1xf32>
    %c0_1 = arith.constant 0 : index
    %c0_2 = arith.constant 0 : index
    %1 = vector.load %arg1[%c0_1, %c0_2] : memref<8x1xi32, #tpu.memory_space<vmem>>, vector<8x1xi32>
    %c0_3 = arith.constant 0 : index
    %c0_4 = arith.constant 0 : index
    %c0_5 = arith.constant 0 : index
    %2 = vector.load %arg4[%c0_3, %c0_4, %c0_5] : memref<4x1x64xf32, #tpu.memory_space<vmem>>, vector<4x1x64xf32>
    %cst = arith.constant 0.000000e+00 : f32
    %3 = vector.broadcast %cst : f32 to vector<4x1x64xf32>
    %4 = arith.subf %3, %2 : vector<4x1x64xf32>
    %5 = math.exp %4 : vector<4x1x64xf32>
    %cst_6 = arith.constant 5.000000e-01 : f32
    %6 = vector.broadcast %cst_6 : f32 to vector<4x1x64xf32>
    %7 = arith.mulf %6, %5 : vector<4x1x64xf32>
    %cst_7 = arith.constant 0.000000e+00 : f32
    %8 = vector.broadcast %cst_7 : f32 to vector<8x32xf32>
    %c0_8 = arith.constant 0 : index
    %c0_9 = arith.constant 0 : index
    %c0_10 = arith.constant 0 : index
    %9 = vector.load %arg3[%c0_8, %c0_9, %c0_10] : memref<4x1x64xf32, #tpu.memory_space<vmem>>, vector<1x1x64xf32>
    %10 = vector.shape_cast %9 : vector<1x1x64xf32> to vector<1x64xf32>
    %11 = vector.broadcast %0 : vector<8x1xf32> to vector<8x64xf32>
    %12 = vector.broadcast %10 : vector<1x64xf32> to vector<8x64xf32>
    %13 = arith.subf %11, %12 : vector<8x64xf32>
    %14 = arith.mulf %13, %13 : vector<8x64xf32>
    %cst_11 = arith.constant 0.000000e+00 : f32
    %15 = vector.broadcast %cst_11 : f32 to vector<8x64xf32>
    %16 = arith.subf %15, %14 : vector<8x64xf32>
    %17 = vector.extract_strided_slice %7 {offsets = [0, 0, 0], sizes = [1, 1, 64], strides = [1, 1, 1]} : vector<4x1x64xf32> to vector<1x1x64xf32>
    %18 = vector.shape_cast %17 : vector<1x1x64xf32> to vector<1x64xf32>
    %19 = vector.broadcast %18 : vector<1x64xf32> to vector<8x64xf32>
    %20 = arith.mulf %16, %19 : vector<8x64xf32>
    %21 = math.exp %20 : vector<8x64xf32>
    %cst_12 = arith.constant dense<0.000000e+00> : vector<8xf32>
    %22 = vector.multi_reduction <add>, %21, %cst_12 [1] : vector<8x64xf32> to vector<8xf32>
    %23 = vector.shape_cast %22 : vector<8xf32> to vector<8x1xf32>
    %24 = tpu.reciprocal %23 {approx = true} : vector<8x1xf32> -> vector<8x1xf32>
    %25 = arith.mulf %23, %24 : vector<8x1xf32>
    %cst_13 = arith.constant 2.000000e+00 : f32
    %26 = vector.broadcast %cst_13 : f32 to vector<8x1xf32>
    %27 = arith.subf %26, %25 : vector<8x1xf32>
    %28 = arith.mulf %24, %27 : vector<8x1xf32>
    %29 = vector.broadcast %28 : vector<8x1xf32> to vector<8x64xf32>
    %30 = arith.mulf %21, %29 : vector<8x64xf32>
    %c0_i32 = arith.constant 0 : i32
    %31 = vector.broadcast %c0_i32 : i32 to vector<8x1xi32>
    %32 = arith.cmpi eq, %1, %31 : vector<8x1xi32>
    %cst_14 = arith.constant 0.000000e+00 : f32
    %33 = vector.shape_cast %32 : vector<8x1xi1> to vector<8x1xi1>
    %34 = vector.broadcast %33 : vector<8x1xi1> to vector<8x64xi1>
    %35 = vector.broadcast %cst_14 : f32 to vector<8x64xf32>
    %36 = arith.select %34, %30, %35 : vector<8x64xi1>, vector<8x64xf32>
    %c0_15 = arith.constant 0 : index
    %c0_16 = arith.constant 0 : index
    %c0_17 = arith.constant 0 : index
    %37 = vector.load %arg5[%c0_15, %c0_16, %c0_17] : memref<4x64x32xf32, #tpu.memory_space<vmem>>, vector<1x64x32xf32>
    %38 = vector.shape_cast %37 : vector<1x64x32xf32> to vector<64x32xf32>
    %cst_18 = arith.constant dense<0.000000e+00> : vector<8x32xf32>
    %39 = tpu.matmul %36, %38, %cst_18 {dimension_numbers = #tpu.dot_dimension_numbers<[1], [0], [0], [1], [0, 0, 1, 1], [], []>} : vector<8x64xf32>, vector<64x32xf32>, vector<8x32xf32> -> vector<8x32xf32>
    %40 = arith.addf %8, %39 : vector<8x32xf32>
    %c1 = arith.constant 1 : index
    %c0_19 = arith.constant 0 : index
    %c0_20 = arith.constant 0 : index
    %41 = vector.load %arg3[%c1, %c0_19, %c0_20] : memref<4x1x64xf32, #tpu.memory_space<vmem>>, vector<1x1x64xf32>
    %42 = vector.shape_cast %41 : vector<1x1x64xf32> to vector<1x64xf32>
    %43 = vector.broadcast %0 : vector<8x1xf32> to vector<8x64xf32>
    %44 = vector.broadcast %42 : vector<1x64xf32> to vector<8x64xf32>
    %45 = arith.subf %43, %44 : vector<8x64xf32>
    %46 = arith.mulf %45, %45 : vector<8x64xf32>
    %cst_21 = arith.constant 0.000000e+00 : f32
    %47 = vector.broadcast %cst_21 : f32 to vector<8x64xf32>
    %48 = arith.subf %47, %46 : vector<8x64xf32>
    %49 = vector.extract_strided_slice %7 {offsets = [1, 0, 0], sizes = [1, 1, 64], strides = [1, 1, 1]} : vector<4x1x64xf32> to vector<1x1x64xf32>
    %50 = vector.shape_cast %49 : vector<1x1x64xf32> to vector<1x64xf32>
    %51 = vector.broadcast %50 : vector<1x64xf32> to vector<8x64xf32>
    %52 = arith.mulf %48, %51 : vector<8x64xf32>
    %53 = math.exp %52 : vector<8x64xf32>
    %cst_22 = arith.constant dense<0.000000e+00> : vector<8xf32>
    %54 = vector.multi_reduction <add>, %53, %cst_22 [1] : vector<8x64xf32> to vector<8xf32>
    %55 = vector.shape_cast %54 : vector<8xf32> to vector<8x1xf32>
    %56 = tpu.reciprocal %55 {approx = true} : vector<8x1xf32> -> vector<8x1xf32>
    %57 = arith.mulf %55, %56 : vector<8x1xf32>
    %cst_23 = arith.constant 2.000000e+00 : f32
    %58 = vector.broadcast %cst_23 : f32 to vector<8x1xf32>
    %59 = arith.subf %58, %57 : vector<8x1xf32>
    %60 = arith.mulf %56, %59 : vector<8x1xf32>
    %61 = vector.broadcast %60 : vector<8x1xf32> to vector<8x64xf32>
    %62 = arith.mulf %53, %61 : vector<8x64xf32>
    %c1_i32 = arith.constant 1 : i32
    %63 = vector.broadcast %c1_i32 : i32 to vector<8x1xi32>
    %64 = arith.cmpi eq, %1, %63 : vector<8x1xi32>
    %cst_24 = arith.constant 0.000000e+00 : f32
    %65 = vector.shape_cast %64 : vector<8x1xi1> to vector<8x1xi1>
    %66 = vector.broadcast %65 : vector<8x1xi1> to vector<8x64xi1>
    %67 = vector.broadcast %cst_24 : f32 to vector<8x64xf32>
    %68 = arith.select %66, %62, %67 : vector<8x64xi1>, vector<8x64xf32>
    %c1_25 = arith.constant 1 : index
    %c0_26 = arith.constant 0 : index
    %c0_27 = arith.constant 0 : index
    %69 = vector.load %arg5[%c1_25, %c0_26, %c0_27] : memref<4x64x32xf32, #tpu.memory_space<vmem>>, vector<1x64x32xf32>
    %70 = vector.shape_cast %69 : vector<1x64x32xf32> to vector<64x32xf32>
    %cst_28 = arith.constant dense<0.000000e+00> : vector<8x32xf32>
    %71 = tpu.matmul %68, %70, %cst_28 {dimension_numbers = #tpu.dot_dimension_numbers<[1], [0], [0], [1], [0, 0, 1, 1], [], []>} : vector<8x64xf32>, vector<64x32xf32>, vector<8x32xf32> -> vector<8x32xf32>
    %72 = arith.addf %40, %71 : vector<8x32xf32>
    %c2 = arith.constant 2 : index
    %c0_29 = arith.constant 0 : index
    %c0_30 = arith.constant 0 : index
    %73 = vector.load %arg3[%c2, %c0_29, %c0_30] : memref<4x1x64xf32, #tpu.memory_space<vmem>>, vector<1x1x64xf32>
    %74 = vector.shape_cast %73 : vector<1x1x64xf32> to vector<1x64xf32>
    %75 = vector.broadcast %0 : vector<8x1xf32> to vector<8x64xf32>
    %76 = vector.broadcast %74 : vector<1x64xf32> to vector<8x64xf32>
    %77 = arith.subf %75, %76 : vector<8x64xf32>
    %78 = arith.mulf %77, %77 : vector<8x64xf32>
    %cst_31 = arith.constant 0.000000e+00 : f32
    %79 = vector.broadcast %cst_31 : f32 to vector<8x64xf32>
    %80 = arith.subf %79, %78 : vector<8x64xf32>
    %81 = vector.extract_strided_slice %7 {offsets = [2, 0, 0], sizes = [1, 1, 64], strides = [1, 1, 1]} : vector<4x1x64xf32> to vector<1x1x64xf32>
    %82 = vector.shape_cast %81 : vector<1x1x64xf32> to vector<1x64xf32>
    %83 = vector.broadcast %82 : vector<1x64xf32> to vector<8x64xf32>
    %84 = arith.mulf %80, %83 : vector<8x64xf32>
    %85 = math.exp %84 : vector<8x64xf32>
    %cst_32 = arith.constant dense<0.000000e+00> : vector<8xf32>
    %86 = vector.multi_reduction <add>, %85, %cst_32 [1] : vector<8x64xf32> to vector<8xf32>
    %87 = vector.shape_cast %86 : vector<8xf32> to vector<8x1xf32>
    %88 = tpu.reciprocal %87 {approx = true} : vector<8x1xf32> -> vector<8x1xf32>
    %89 = arith.mulf %87, %88 : vector<8x1xf32>
    %cst_33 = arith.constant 2.000000e+00 : f32
    %90 = vector.broadcast %cst_33 : f32 to vector<8x1xf32>
    %91 = arith.subf %90, %89 : vector<8x1xf32>
    %92 = arith.mulf %88, %91 : vector<8x1xf32>
    %93 = vector.broadcast %92 : vector<8x1xf32> to vector<8x64xf32>
    %94 = arith.mulf %85, %93 : vector<8x64xf32>
    %c2_i32 = arith.constant 2 : i32
    %95 = vector.broadcast %c2_i32 : i32 to vector<8x1xi32>
    %96 = arith.cmpi eq, %1, %95 : vector<8x1xi32>
    %cst_34 = arith.constant 0.000000e+00 : f32
    %97 = vector.shape_cast %96 : vector<8x1xi1> to vector<8x1xi1>
    %98 = vector.broadcast %97 : vector<8x1xi1> to vector<8x64xi1>
    %99 = vector.broadcast %cst_34 : f32 to vector<8x64xf32>
    %100 = arith.select %98, %94, %99 : vector<8x64xi1>, vector<8x64xf32>
    %c2_35 = arith.constant 2 : index
    %c0_36 = arith.constant 0 : index
    %c0_37 = arith.constant 0 : index
    %101 = vector.load %arg5[%c2_35, %c0_36, %c0_37] : memref<4x64x32xf32, #tpu.memory_space<vmem>>, vector<1x64x32xf32>
    %102 = vector.shape_cast %101 : vector<1x64x32xf32> to vector<64x32xf32>
    %cst_38 = arith.constant dense<0.000000e+00> : vector<8x32xf32>
    %103 = tpu.matmul %100, %102, %cst_38 {dimension_numbers = #tpu.dot_dimension_numbers<[1], [0], [0], [1], [0, 0, 1, 1], [], []>} : vector<8x64xf32>, vector<64x32xf32>, vector<8x32xf32> -> vector<8x32xf32>
    %104 = arith.addf %72, %103 : vector<8x32xf32>
    %c3 = arith.constant 3 : index
    %c0_39 = arith.constant 0 : index
    %c0_40 = arith.constant 0 : index
    %105 = vector.load %arg3[%c3, %c0_39, %c0_40] : memref<4x1x64xf32, #tpu.memory_space<vmem>>, vector<1x1x64xf32>
    %106 = vector.shape_cast %105 : vector<1x1x64xf32> to vector<1x64xf32>
    %107 = vector.broadcast %0 : vector<8x1xf32> to vector<8x64xf32>
    %108 = vector.broadcast %106 : vector<1x64xf32> to vector<8x64xf32>
    %109 = arith.subf %107, %108 : vector<8x64xf32>
    %110 = arith.mulf %109, %109 : vector<8x64xf32>
    %cst_41 = arith.constant 0.000000e+00 : f32
    %111 = vector.broadcast %cst_41 : f32 to vector<8x64xf32>
    %112 = arith.subf %111, %110 : vector<8x64xf32>
    %113 = vector.extract_strided_slice %7 {offsets = [3, 0, 0], sizes = [1, 1, 64], strides = [1, 1, 1]} : vector<4x1x64xf32> to vector<1x1x64xf32>
    %114 = vector.shape_cast %113 : vector<1x1x64xf32> to vector<1x64xf32>
    %115 = vector.broadcast %114 : vector<1x64xf32> to vector<8x64xf32>
    %116 = arith.mulf %112, %115 : vector<8x64xf32>
    %117 = math.exp %116 : vector<8x64xf32>
    %cst_42 = arith.constant dense<0.000000e+00> : vector<8xf32>
    %118 = vector.multi_reduction <add>, %117, %cst_42 [1] : vector<8x64xf32> to vector<8xf32>
    %119 = vector.shape_cast %118 : vector<8xf32> to vector<8x1xf32>
    %120 = tpu.reciprocal %119 {approx = true} : vector<8x1xf32> -> vector<8x1xf32>
    %121 = arith.mulf %119, %120 : vector<8x1xf32>
    %cst_43 = arith.constant 2.000000e+00 : f32
    %122 = vector.broadcast %cst_43 : f32 to vector<8x1xf32>
    %123 = arith.subf %122, %121 : vector<8x1xf32>
    %124 = arith.mulf %120, %123 : vector<8x1xf32>
    %125 = vector.broadcast %124 : vector<8x1xf32> to vector<8x64xf32>
    %126 = arith.mulf %117, %125 : vector<8x64xf32>
    %c3_i32 = arith.constant 3 : i32
    %127 = vector.broadcast %c3_i32 : i32 to vector<8x1xi32>
    %128 = arith.cmpi eq, %1, %127 : vector<8x1xi32>
    %cst_44 = arith.constant 0.000000e+00 : f32
    %129 = vector.shape_cast %128 : vector<8x1xi1> to vector<8x1xi1>
    %130 = vector.broadcast %129 : vector<8x1xi1> to vector<8x64xi1>
    %131 = vector.broadcast %cst_44 : f32 to vector<8x64xf32>
    %132 = arith.select %130, %126, %131 : vector<8x64xi1>, vector<8x64xf32>
    %c3_45 = arith.constant 3 : index
    %c0_46 = arith.constant 0 : index
    %c0_47 = arith.constant 0 : index
    %133 = vector.load %arg5[%c3_45, %c0_46, %c0_47] : memref<4x64x32xf32, #tpu.memory_space<vmem>>, vector<1x64x32xf32>
    %134 = vector.shape_cast %133 : vector<1x64x32xf32> to vector<64x32xf32>
    %cst_48 = arith.constant dense<0.000000e+00> : vector<8x32xf32>
    %135 = tpu.matmul %132, %134, %cst_48 {dimension_numbers = #tpu.dot_dimension_numbers<[1], [0], [0], [1], [0, 0, 1, 1], [], []>} : vector<8x64xf32>, vector<64x32xf32>, vector<8x32xf32> -> vector<8x32xf32>
    %136 = arith.addf %104, %135 : vector<8x32xf32>
    %c0_49 = arith.constant 0 : index
    %c0_50 = arith.constant 0 : index
    %137 = vector.load %arg6[%c0_49, %c0_50] : memref<8x32xf32, #tpu.memory_space<vmem>>, vector<8x32xf32>
    tpu.vector_store %arg6[%c0_49, %c0_50], %136 {strides = array<i32>} : memref<8x32xf32, #tpu.memory_space<vmem>>, vector<8x32xf32>,
    return
  }
  func.func @transform_0(%arg0: i32) -> (i32, i32) {
    %c0_i32 = arith.constant 0 : i32
    %c0_i32_0 = arith.constant 0 : i32
    return %arg0, %c0_i32 : i32, i32
  }
  func.func @transform_1(%arg0: i32) -> (i32, i32) {
    %c0_i32 = arith.constant 0 : i32
    %c0_i32_0 = arith.constant 0 : i32
    return %arg0, %c0_i32 : i32, i32
  }
  func.func @transform_2(%arg0: i32) -> (i32, i32, i32) {
    %c0_i32 = arith.constant 0 : i32
    %c0_i32_0 = arith.constant 0 : i32
    %c0_i32_1 = arith.constant 0 : i32
    %c0_i32_2 = arith.constant 0 : i32
    return %c0_i32, %c0_i32_0, %c0_i32_1 : i32, i32, i32
  }
  func.func @transform_3(%arg0: i32) -> (i32, i32, i32) {
    %c0_i32 = arith.constant 0 : i32
    %c0_i32_0 = arith.constant 0 : i32
    %c0_i32_1 = arith.constant 0 : i32
    %c0_i32_2 = arith.constant 0 : i32
    return %c0_i32, %c0_i32_0, %c0_i32_1 : i32, i32, i32
  }
  func.func @transform_4(%arg0: i32) -> (i32, i32, i32) {
    %c0_i32 = arith.constant 0 : i32
    %c0_i32_0 = arith.constant 0 : i32
    %c0_i32_1 = arith.constant 0 : i32
    %c0_i32_2 = arith.constant 0 : i32
    return %c0_i32, %c0_i32_0, %c0_i32_1 : i32, i32, i32
  }
  func.func @transform_5(%arg0: i32) -> (i32, i32) {
    %c0_i32 = arith.constant 0 : i32
    %c0_i32_0 = arith.constant 0 : i32
    return %arg0, %c0_i32 : i32, i32
  }
}

</mosaic_0001>

<bundles_post_ra>
// kernel: tpu_custom_call.1
= control target key start
LH: loop header
LB: loop body
LE: loop exit
PB: predicated region body
PF: predicated region fallthrough
CT: control target
= control target key end

     0   :  { %10 = vsyncpa [#allocation3], 0  ;;  %s1472_s0 = inlined_call_operand.vmem [shape: s32[24,1], index: 0, kind: input, shape index: {}]   ;;  %s1473_s1 = inlined_call_operand.vmem [shape: f32[24,1], index: 1, kind: input, shape index: {}]   ;;  %s1474_s2 = inlined_call_operand.vmem [shape: f32[4,1,64], index: 2, kind: input, shape index: {}]   ;;  %s1475_s3 = inlined_call_operand.vmem [shape: f32[4,1,64], index: 3, kind: input, shape index: {}]   ;;  %s1476_s4 = inlined_call_operand.vmem [shape: f32[4,64,32], index: 4, kind: input, shape index: {}]   ;;  %s1477_s5 = inlined_call_operand.hbm [shape: f32[24,32], index: 5, kind: output, shape index: {}]  }
   0x1   :  { %12 = vsyncpa [#allocation3 + $0x1], 0  ;;  %s1199_s18 = smov 0   ;;  %s1201_s19 = smov 0  }
   0x2   :  { %s1203_s20 = smov 0   ;;  %s1205_s21 = smov 0  }
   0x3 LB: > { %s1220_s22 = sadd.s32 4294967295, %s1162_s21   ;;  %s820_s23 = sadd.s32 4294967294, %s1162_s21   ;;  %s1162_s21 = sphi %s1205_s21, %s1483_s21   ;;  %s1158_s20 = sphi %s1203_s20, %s1482_s20   ;;  %s1154_s19 = sphi %s1201_s19, %s1481_s19   ;;  %s1150_s18 = sphi %s1199_s18, %s1480_s18  }
   0x4   : > { %s1224_s24 = sadd.s32 1, %s1162_s21   ;;  %s140_s25 = sadd.s32 1, %s1158_s20 }
   0x5   : > { %s137_s26 = ssub.s32 %s1162_s21, %s1224_s24  ;;  %p150_p0 = scmp.ne.s32.totalorder %s1158_s20, %s1154_s19 }
   0x6   : > { %p138_p1 = scmp.eq.s32.totalorder %s137_s26, 0  ;;  %p151_p2 = scmp.eq.s32.totalorder %s1220_s22, 2 }
   0x7   : > { %p156_p3 = scmp.ne.s32.totalorder %s1154_s19, %s1150_s18  ;;  %p157_p4 = scmp.eq.s32.totalorder %s820_s23, 2 }
   0x8   : > { %s1235_s27 = scalar_select %p138_p1, %s1158_s20, %s140_s25  }
   0x9   : > { %p1237_p5 = por %p151_p2, %p150_p0  ;;  %p1241_p6 = por %p157_p4, %p156_p3 }
   0xa   : > { %p823_p7 = scmp.ge.s32.totalorder %s1162_s21, 1  ;;  %p198_p8 = scmp.lt.s32.totalorder %s1162_s21, 4 }
   0xc   : > { %p199_p9 = pnand %p823_p7, %p198_p8 }
   0xd   : > { %p229_p10 = scmp.lt.s32.totalorder (!%p199_p9), %s1220_s22, 2  ;;  %v1164_v0 = vmov (!%p199_p9), 0   ;;  %v239_v7 = vld [vmem:[%s1475_s3] sm:$0x1] (!%p199_p9)  ;;  %v240_v8 = vld [vmem:[%s1475_s3 + $0x1] sm:$0x1] (!%p199_p9)  ;;  %v275_v19 = vlaneseq (!%p199_p9) }
   0xe   : > { %202 = sbr.rel (%p199_p9) target bundleno = 583 (0x247), region = 40  ;;  %1074 = vset.pattern.permute.xlu0 (!%p199_p9), %v1164_v0  ;;  %1075 = vset.pattern.permute.xlu1 (!%p199_p9), %v1164_v0  ;;  %v241_v9 = vld [vmem:[%s1475_s3 + $0x2] sm:$0x1] (!%p199_p9)  ;;  %v243_v10 = vsub.f32 (!%p199_p9), 0.0, %v239_v7  ;;  %v244_v11 = vsub.f32 (!%p199_p9), 0.0, %v240_v8  ;;  %vm283_vm4 = vcmask (!%p199_p9), 523264  }
   0xf   : > { %v245_v12 = vsub.f32 (!%p199_p9), 0.0, %v241_v9  ;;  %v242_v13 = vld [vmem:[%s1475_s3 + $0x3] sm:$0x1] (!%p199_p9)  ;;  %v276_v22 = vshrl.u32 (!%p199_p9), %v275_v19, 7  ;;  %v827_v24 = vld [vmem:[%s1474_s2] ss:$0 sm:$0xff] (!%p199_p9) }
  0x10   : > { %v247_v14 = vmul.f32 (!%p199_p9), 1.442695, %v243_v10  ;;  %v249_v15 = vmul.f32 (!%p199_p9), 1.442695, %v244_v11  ;;  %v246_v16 = vsub.f32 (!%p199_p9), 0.0, %v242_v13  ;;  %v842_v7 = vld [vmem:[%s1476_s4 + $0x80] sm:$0xff] (!%p199_p9) }
  0x11   : > { %v251_v17 = vmul.f32 (!%p199_p9), 1.442695, %v245_v12  ;;  %v829_v25 = vld [vmem:[%s1474_s2 + $0x1] ss:$0 sm:$0xff] (!%p199_p9)  ;;  %v841_v26 = vld [vmem:[%s1474_s2 + $0x2] ss:$0 sm:$0xff] (!%p199_p9) }
  0x12   : > { %1076 = vpow2.f32 (!%p199_p9), %v247_v14  ;;  %v253_v18 = vmul.f32 (!%p199_p9), 1.442695, %v246_v16  ;;  %v277_v30 = vsub.s32 (!%p199_p9), 0, %v276_v22  ;;  %v852_v31 = vld [vmem:[%s1474_s2 + $0x3] ss:$0 sm:$0xff] (!%p199_p9)  ;;  %v843_v9 = vld [vmem:[%s1476_s4 + $0x88] sm:$0xff] (!%p199_p9) }
  0x13   : > { %1078 = vpow2.f32 (!%p199_p9), %v249_v15  ;;  %v1165_v10 = vmov (!%p199_p9), 0.0|0.0   ;;  %v1003_v11 = vpack.c.bf16 (!%p199_p9), %v843_v9, %v842_v7  ;;  %v832_v12 = vld [vmem:[%s1476_s4 + $0x50] sm:$0xff] (!%p199_p9)  ;;  %v833_v13 = vld [vmem:[%s1476_s4 + $0x58] sm:$0xff] (!%p199_p9)  ;;  %v846_v19 = vld [vmem:[%s1476_s4 + $0xa0] sm:$0xff] (!%p199_p9)  ;;  %vm1166_vm5 = vmmov (!%p199_p9), 0   ;;  %s226_s13 = sand.u32 (!%p199_p9), 1, %s1154_s19  }
  0x14   : > { %1080 = vpow2.f32 (!%p199_p9), %v251_v17  ;;  %978 = vmatprep.subr.bf16.mxu1 (!%p199_p9), %v1165_v10  ;;  %1002 = vmatprep.subr.bf16.mxu0 (!%p199_p9), %v1165_v10  ;;  %v844_v14 = vld [vmem:[%s1476_s4 + $0x90] sm:$0xff] (!%p199_p9)  ;;  %v982_v15 = vpack.c.bf16 (!%p199_p9), %v833_v13, %v832_v12  ;;  %v845_v16 = vld [vmem:[%s1476_s4 + $0x98] sm:$0xff] (!%p199_p9)  ;;  %v858_v7 = vld [vmem:[%s1476_s4 + $0xe8] sm:$0xff] (!%p199_p9)  ;;  %s824_s14 = sshll.u32 (!%p199_p9), %s226_s13, 3  ;;  %s863_s15 = sshll.u32 (!%p199_p9), %s1220_s22, 7  ;;  %vm733_vm10 = vcmask (!%p199_p9), 261120  }
  0x15   : > { %s230_s30 = scalar_select %p229_p10, %s1220_s22, 2  ;;  %1082 = vpow2.f32 %v253_v18  ;;  %1004 = vmatpush3.bf16.msra.mxu0 %v1003_v11  ;;  %v1006_v17 = vpack.c.bf16 %v845_v16, %v844_v14  ;;  %v834_v18 = vld [vmem:[%s1476_s4 + $0x60] sm:$0xff]  ;;  %v305_v12 = vld [vmem:[%s1476_s4 + $0x30] sm:$0xff]  ;;  %v306_v13 = vld [vmem:[%s1476_s4 + $0x38] sm:$0xff] }
  0x16   : > { %1005 = vmatprep.subr.bf16.mxu0 %v1165_v10  ;;  %v860_v16 = vld [vmem:[%s1476_s4 + $0xf8] sm:$0xff]  ;;  %s228_s16 = scalar_lea.vmem [#allocation2], %s824_s14  ;;  %s1430_s26 = scalar_lea.hbm %s1477_s5, %s863_s15 }
  0x17   : > { %s825_s6 = sshll.u32 %s230_s30, 3  ;;  %s749_s17 = sshll.u32 %s228_s16, 4  ;;  %s1432_s17 = int_to_ptr.vmem [resolvable:$true] %s749_s17 }
  0x18   : > { %s236_s9 = scalar_lea.vmem %s1473_s1, %s825_s6  ;;  %s232_s12 = scalar_lea.vmem %s1472_s0, %s825_s6 }
  0x19   : > { %v237_v1 = vld [vmem:[%s236_s9] sm:$0xff]  ;;  %1007 = vmatpush3.bf16.msra.mxu0 %v1006_v17  ;;  %s736_s22 = scalar_lea.sflag [#allocation3], %s226_s13  ;;  %s1100_s30 = scalar_lea.vmem %s1432_s17, 128 }
  0x1a   : > { %v238_v2 = vld [vmem:[%s232_s12] sm:$0xff]  ;;  %262 = vperm.xlu0 %1074, %v237_v1   ;;  %1008 = vmatprep.subr.bf16.mxu0 %v1165_v10  ;;  %p1101_p11 = scmp.ne.s32.totalorder %s1432_s17, %s1100_s30  ;;  %s1168_s6 = smov [#allocation2]  }
  0x1b   : > { %vm335_vm0 = vcmp.eq.s32.totalorder %v238_v2, 1  ;;  %vm525_vm1 = vcmp.eq.s32.totalorder %v238_v2, 2  ;;  %vm643_vm2 = vcmp.eq.s32.totalorder %v238_v2, 3  ;;  %vm292_vm3 = vcmp.eq.s32.totalorder %v238_v2, 0  ;;  %s1104_s7 = sshll.u32 %s1168_s6, 4  ;;  %s1105_s7 = int_to_ptr.vmem [resolvable:$false] %s1104_s7 }
  0x1c   : > { %v336_v3 = vsel %vm335_vm0, 1, %v1164_v0  ;;  %v526_v4 = vsel %vm525_vm1, 1, %v1164_v0  ;;  %v1255_v5 = vsel %vm643_vm2, 1, %v1164_v0  ;;  %v1257_v6 = vsel %vm292_vm3, 1, %v1164_v0  ;;  %v1077_v20 = vpop.eup %1076  ;;  %p1102_p12 = pnand %p1101_p11, %p1237_p5  ;;  %s1106_s8 = scalar_lea.vmem %s1105_s7, 256 }
  0x1d   : > { %338 = vperm.xlu1 %1075, %v336_v3   ;;  %v1079_v21 = vpop.eup %1078  ;;  %v255_v27 = vmul.f32 0.5, %v1077_v20  ;;  %v830_v3 = vld [vmem:[%s1476_s4 + $0x40] sm:$0xff]  ;;  %p1107_p0 = scmp.lt.s32.totalorder %s1432_s17, %s1105_s7  ;;  %p1108_p1 = scmp.lt.s32.totalorder %s1106_s8, %s1100_s30 }
  0x1e   : > { %v1081_v23 = vpop.eup %1080  ;;  %v256_v28 = vmul.f32 0.5, %v1079_v21  ;;  %v847_v21 = vld [vmem:[%s1476_s4 + $0xa8] sm:$0xff]  ;;  %p1103_p13 = pneg %p1102_p12 }
  0x1f   : > { %v257_v29 = vmul.f32 0.5, %v1081_v23  ;;  %v1083_v32 = vpop.eup %1082  ;;  %v278_v39 = vrot.slane %v255_v27, %v277_v30  ;;  %v1009_v22 = vpack.c.bf16 %v847_v21, %v846_v19  ;;  %v836_v23 = vld [vmem:[%s1476_s4 + $0x70] sm:$0xff]  ;;  %p1109_p2 = por %p1108_p1, %p1107_p0 }
  0x20   : > { %v258_v38 = vmul.f32 0.5, %v1083_v32  ;;  %v322_v40 = vrot.slane %v256_v28, %v277_v30  ;;  %v1167_v28 = vmov 0.0  }
  0x21   : > { %528 = vperm.xlu1 %1075, %v526_v4   ;;  %v512_v41 = vrot.slane %v257_v29, %v277_v30  ;;  %v831_v4 = vld [vmem:[%s1476_s4 + $0x48] sm:$0xff]  ;;  %1010 = vmatpush3.bf16.msra.mxu0 %v1009_v22  ;;  %p1110_p3 = pnand %p1109_p2, %p1103_p13 }
  0x22   : > { %v630_v49 = vrot.slane %v258_v38, %v277_v30  ;;  %v979_v8 = vpack.c.bf16 %v831_v4, %v830_v3  ;;  %1011 = vmatprep.subr.bf16.mxu0 %v1165_v10  ;;  %918 = vmatprep.mubr.msk.f32.mxu1 %vm1166_vm5, %v1167_v28  ;;  %v857_v4 = vld [vmem:[%s1476_s4 + $0xe0] sm:$0xff] }
  0x23   : > { %956 = vmatprep.mubr.msk.f32.mxu0 %vm1166_vm5, %v1167_v28  ;;  %v1021_v11 = vpack.c.bf16 %v858_v7, %v857_v4 }
  0x24   : > { %980 = vmatpush3.bf16.msra.mxu1 %v979_v8 }
  0x25   : > { %981 = vmatprep.subr.bf16.mxu1 %v1165_v10 }
  0x28   : > { %983 = vmatpush3.bf16.msra.mxu1 %v982_v15  ;;  %v859_v15 = vld [vmem:[%s1476_s4 + $0xf0] sm:$0xff] }
  0x29   : > { %984 = vmatprep.subr.bf16.mxu1 %v1165_v10 }
  0x99   : > { %v263_v33 = vpop.permute.xlu0 %262 }
  0x9a   : > { %v271_v34 = vsub.f32 %v263_v33, %v827_v24  ;;  %v315_v35 = vsub.f32 %v263_v33, %v829_v25  ;;  %v505_v36 = vsub.f32 %v263_v33, %v841_v26  ;;  %v623_v37 = vsub.f32 %v263_v33, %v852_v31  ;;  %v848_v24 = vld [vmem:[%s1476_s4 + $0xb0] sm:$0xff]  ;;  %v849_v26 = vld [vmem:[%s1476_s4 + $0xb8] sm:$0xff] }
  0x9b   : > { %v1012_v27 = vpack.c.bf16 %v849_v26, %v848_v24 }
  0x9c   : > { %v272_v42 = vmul.f32 %v271_v34, %v271_v34  ;;  %v316_v43 = vmul.f32 %v315_v35, %v315_v35  ;;  %v506_v44 = vmul.f32 %v505_v36, %v505_v36  ;;  %v624_v45 = vmul.f32 %v623_v37, %v623_v37  ;;  %v339_v29 = vpop.permute.xlu1 %338 }
  0x9d   : > { %1013 = vmatpush3.bf16.msra.mxu0 %v1012_v27  ;;  %vm340_vm6 = vcmp.eq.s32.totalorder %v339_v29, 1 }
  0x9e   : > { %v273_v46 = vsub.f32 0.0, %v272_v42  ;;  %v317_v47 = vsub.f32 0.0, %v316_v43  ;;  %v507_v48 = vsub.f32 0.0, %v506_v44  ;;  %v625_v53 = vsub.f32 0.0, %v624_v45  ;;  %1014 = vmatprep.subr.bf16.mxu0 %v1165_v10  ;;  %v300_v42 = vld [vmem:[%s1476_s4 + $0x8] sm:$0xff]  ;;  %v853_v44 = vld [vmem:[%s1476_s4 + $0xc0] sm:$0xff] }
  0x9f   : > { %v854_v45 = vld [vmem:[%s1476_s4 + $0xc8] sm:$0xff] }
  0xa0   : > { %v280_v50 = vmul.f32 %v278_v39, %v273_v46  ;;  %v324_v51 = vmul.f32 %v322_v40, %v317_v47  ;;  %v514_v52 = vmul.f32 %v512_v41, %v507_v48  ;;  %v632_v57 = vmul.f32 %v630_v49, %v625_v53  ;;  %v529_v30 = vpop.permute.xlu1 %528  ;;  %v299_v41 = vld [vmem:[%s1476_s4] sm:$0xff]  ;;  %v302_v53 = vld [vmem:[%s1476_s4 + $0x18] sm:$0xff] }
  0xa1   : > { %v991_v49 = vpack.c.bf16 %v300_v42, %v299_v41  ;;  %vm530_vm7 = vcmp.eq.s32.totalorder %v529_v30, 1 }
  0xa2   : > { %v325_v54 = vmul.f32 1.442695, %v324_v51  ;;  %v515_v55 = vmul.f32 1.442695, %v514_v52  ;;  %v281_v56 = vmul.f32 1.442695, %v280_v50  ;;  %v1015_v51 = vpack.c.bf16 %v854_v45, %v853_v44 }
  0xa3   : > { %v633_v58 = vmul.f32 1.442695, %v632_v57  ;;  %v301_v52 = vld [vmem:[%s1476_s4 + $0x10] sm:$0xff] }
  0xa4   : > { %1084 = vpow2.f32 %v325_v54  ;;  %v855_v57 = vld [vmem:[%s1476_s4 + $0xd0] sm:$0xff] }
  0xa5   : > { %1086 = vpow2.f32 %v515_v55 }
  0xa6   : > { %1088 = vpow2.f32 %v281_v56 }
  0xa7   : > { %1090 = vpow2.f32 %v633_v58  ;;  %v856_v58 = vld [vmem:[%s1476_s4 + $0xd8] sm:$0xff] }
  0xae   : > { %v1283_v59 = vpop.eup %1084 }
  0xaf   : > { %v1285_v60 = vpop.eup %1086  ;;  %v327_v61 = vsel %vm283_vm4, %v1283_v59, 0.0 }
  0xb0   : > { %328 = vadd.xlane.f32.xlu0 %v327_v61  ;;  %v517_v62 = vsel %vm283_vm4, %v1285_v60, 0.0  ;;  %v1291_v63 = vpop.eup %1088  ;;  %v994_v61 = vpack.c.bf16 %v302_v53, %v301_v52 }
  0xb1   : > { %518 = vadd.xlane.f32.xlu1 %v517_v62  ;;  %v284_v0 = vsel %vm283_vm4, %v1291_v63, 0.0  ;;  %v1295_v1 = vpop.eup %1090  ;;  %v1018_v62 = vpack.c.bf16 %v856_v58, %v855_v57 }
  0xb2   : > { %v635_v2 = vsel %vm283_vm4, %v1295_v1, 0.0 }
  0xb5   : > { %285 = vadd.xlane.f32.xlu1 %v284_v0  ;;  %v303_v0 = vld [vmem:[%s1476_s4 + $0x20] sm:$0xff] }
  0xb9   : > { %636 = vadd.xlane.f32.xlu1 %v635_v2  ;;  %v304_v2 = vld [vmem:[%s1476_s4 + $0x28] sm:$0xff] }
  0xba   : > { %v997_v9 = vpack.c.bf16 %v304_v2, %v303_v0 }
  0xc6   : > { %646 = vperm.xlu0 %1074, %v1255_v5   ;;  %v835_v5 = vld [vmem:[%s1476_s4 + $0x68] sm:$0xff] }
  0xc7   : > { %v985_v20 = vpack.c.bf16 %v835_v5, %v834_v18  ;;  %v1000_v18 = vpack.c.bf16 %v306_v13, %v305_v12  ;;  %v1024_v5 = vpack.c.bf16 %v860_v16, %v859_v15 }
  0xc9   : > { %986 = vmatpush3.bf16.msra.mxu1 %v985_v20 }
  0xca   : > { %295 = vperm.xlu1 %1075, %v1257_v6   ;;  %987 = vmatprep.subr.bf16.mxu1 %v1165_v10  ;;  %v837_v6 = vld [vmem:[%s1476_s4 + $0x78] sm:$0xff] }
  0xcb   : > { %v988_v25 = vpack.c.bf16 %v837_v6, %v836_v23 }
  0xcd   : > { %989 = vmatpush3.bf16.msra.mxu1 %v988_v25 }
  0xce   : > { %990 = vmatprep.subr.bf16.mxu1 %v1165_v10 }
 0x13d   : > { %v329_v31 = vpop.xlane.xlu0 %328 }
 0x13e   : > { %1092 = vrcp.f32 %v329_v31  ;;  %v519_v32 = vpop.xlane.xlu1 %518 }
 0x13f   : > { %1094 = vrcp.f32 %v519_v32 }
 0x142   : > { %v286_v33 = vpop.xlane.xlu1 %285 }
 0x143   : > { %1096 = vrcp.f32 %v286_v33 }
 0x145   : > { %v647_v21 = vpop.permute.xlu0 %646 }
 0x146   : > { %v637_v34 = vpop.xlane.xlu1 %636  ;;  %vm648_vm9 = vcmp.eq.s32.totalorder %v647_v21, 1 }
 0x147   : > { %1098 = vrcp.f32 %v637_v34 }
 0x148   : > { %v1093_v35 = vpop.eup %1092 }
 0x149   : > { %v1095_v36 = vpop.eup %1094  ;;  %v331_v37 = vmul.f32 %v1093_v35, %v329_v31 }
 0x14a   : > { %v521_v38 = vmul.f32 %v1095_v36, %v519_v32  ;;  %v296_v20 = vpop.permute.xlu1 %295 }
 0x14b   : > { %v332_v39 = vsub.f32 2.0, %v331_v37  ;;  %vm297_vm8 = vcmp.eq.s32.totalorder %v296_v20, 1 }
 0x14c   : > { %v522_v40 = vsub.f32 2.0, %v521_v38 }
 0x14d   : > { %v333_v43 = vmul.f32 %v1093_v35, %v332_v39  ;;  %v1097_v46 = vpop.eup %1096 }
 0x14e   : > { %v523_v47 = vmul.f32 %v1095_v36, %v522_v40  ;;  %v288_v55 = vmul.f32 %v1097_v46, %v286_v33 }
 0x14f   : > { %v334_v48 = vmul.f32 %v1283_v59, %v333_v43 }
 0x150   : > { %v524_v50 = vmul.f32 %v1285_v60, %v523_v47  ;;  %v289_v3 = vsub.f32 2.0, %v288_v55 }
 0x151   : > { %v1099_v54 = vpop.eup %1098  ;;  %v341_v56 = vsel %vm340_vm6, %v334_v48, 0.0 }
 0x152   : > { %v639_v59 = vmul.f32 %v1099_v54, %v637_v34  ;;  %919 = vmatmul.mubr.msk.f32.vlgmr.msra.gmra.mrb[0].mxu1 %vm283_vm4, %v341_v56  ;;  %v531_v60 = vsel %vm530_vm7, %v524_v50, 0.0  ;;  %v290_v14 = vmul.f32 %v1097_v46, %v289_v3 }
 0x153   : > { %992 = vmatpush3.bf16.msra.mxu1 %v991_v49  ;;  %957 = vmatmul.mubr.msk.f32.vlgmr.msra.gmra.mrb[0].mxu0 %vm283_vm4, %v531_v60 }
 0x154   : > { %1016 = vmatpush3.bf16.msra.mxu0 %v1015_v51  ;;  %993 = vmatprep.subr.bf16.mxu1 %v1165_v10  ;;  %v640_v8 = vsub.f32 2.0, %v639_v59  ;;  %v291_v19 = vmul.f32 %v1291_v63, %v290_v14 }
 0x155   : > { %1017 = vmatprep.subr.bf16.mxu0 %v1165_v10  ;;  %937 = vmatprep.mubr.msk.f32.mxu1 %vm1166_vm5, %v1167_v28 }
 0x156   : > { %975 = vmatprep.mubr.msk.f32.mxu0 %vm1166_vm5, %v1167_v28  ;;  %v641_v17 = vmul.f32 %v1099_v54, %v640_v8  ;;  %v298_v23 = vsel %vm297_vm8, %v291_v19, 0.0 }
 0x157   : > { %995 = vmatpush3.bf16.msra.mxu1 %v994_v61 }
 0x158   : > { %1019 = vmatpush3.bf16.msra.mxu0 %v1018_v62  ;;  %996 = vmatprep.subr.bf16.mxu1 %v1165_v10  ;;  %v642_v22 = vmul.f32 %v1295_v1, %v641_v17 }
 0x159   : > { %1020 = vmatprep.subr.bf16.mxu0 %v1165_v10 }
 0x15a   : > { %v649_v6 = vsel %vm648_vm9, %v642_v22, 0.0 }
 0x15b   : > { %998 = vmatpush3.bf16.msra.mxu1 %v997_v9 }
 0x15c   : > { %1022 = vmatpush3.bf16.msra.mxu0 %v1021_v11  ;;  %999 = vmatprep.subr.bf16.mxu1 %v1165_v10 }
 0x15d   : > { %1023 = vmatprep.subr.bf16.mxu0 %v1165_v10 }
 0x15f   : > { %1001 = vmatpush3.bf16.msra.mxu1 %v1000_v18 }
 0x160   : > { %1025 = vmatpush3.bf16.msra.mxu0 %v1024_v5 }
 0x162   : > { %938 = vmatmul.mubr.msk.f32.vlgmr.msra.gmra.mrb[0].mxu1 %vm283_vm4, %v298_v23 }
 0x163   : > { %976 = vmatmul.mubr.msk.f32.vlgmr.msra.gmra.mrb[0].mxu0 %vm283_vm4, %v649_v6 }
 0x235   : > { %v493_v63 = vpop.f32.mrb[0].mxu1 }
 0x236   : > { %v728_v10 = vpop.f32.mrb[0].mxu0  ;;  %v939_v24 = vpop.f32.mrb[1].mxu1 }
 0x237   : > { %v1026_v1 = vadd.f32 %v728_v10, %v493_v63  ;;  %v977_v25 = vpop.f32.mrb[1].mxu0 }
 0x239   : > { %734 = vst.msk [vmem:[%s228_s16] sm:$0xff] %vm733_vm10, %v1026_v1 }
 0x23a   : > { %1113 = shalt.err (!%p1110_p3)
}
 0x23b   : > { %s1114_s9 = scalar_lea.hbm %s1430_s26, 128  ;;  %s1118_s12 = scalar_lea.hbm %s1477_s5, 384 }
 0x23c   : > { %p1115_p4 = scmp.ne.s32.totalorder %s1430_s26, %s1114_s9  ;;  %p1119_p9 = scmp.lt.u32.totalorder %s1430_s26, %s1477_s5 }
 0x23d   : > { %p1120_p10 = scmp.lt.u32.totalorder %s1118_s12, %s1114_s9  ;;  %p1122_p12 = scmp.lt.u32.totalorder %s1114_s9, %s1430_s26 }
 0x23e   : > { %p1116_p7 = pnand %p1115_p4, %p1237_p5 }
 0x23f   : > { %p1121_p11 = por %p1120_p10, %p1119_p9 }
 0x240   : > { %p1117_p8 = pneg %p1116_p7 }
 0x241   : > { %p1123_p13 = por %p1122_p12, %p1121_p11 }
 0x243   : > { %p1124_p0 = pnand %p1123_p13, %p1117_p8 }
 0x245   : > { %1127 = shalt.err (!%p1124_p0)
}
 0x246   : > { %1031 = dma.vmem_to_hbm [thread:$0]  (%p1237_p5), %s1432_s17, 128, %s1430_s26, %s736_s22  }
 0x247 PF: > { %p1037_p1 = scmp.ge.s32.totalorder %s1162_s21, 2  ;;  %s761_s15 = sand.u32 1, %s1150_s18  }
 0x248   : > { %s762_s16 = scalar_lea.sflag [#allocation3], %s761_s15 }
 0x249   : > { %p1034_p2 = pnand %p1037_p1, %p1241_p6 }
 0x24b   : > { %1145 = dma.done.wait (!%p1034_p2), %s762_s16, 128  }
 0x24c   : > { %1147 = vsyncadd (!%p1034_p2), %s762_s16, 4294967168  ;;  %p15_p3 = scmp.ge.s32.totalorder %s1224_s24, 5   ;;  %s1480_s18 = smov %s1154_s19 }
 0x24d   : > { %s1481_s19 = smov %s1158_s20  ;;  %s1482_s20 = smov %s1235_s27 }
 0x24e   : > { %s1483_s21 = smov %s1224_s24  ;;  %17 = sbr.rel (!%p15_p3) target bundleno = 3 (0x3), region = 84 }
 0x255   :  { %767 = vsyncpa [#allocation3], 1 }
 0x256   :  { %769 = vsyncpa [#allocation3 + $0x1], 1 }

</bundles_post_ra>
